<compile_context>
chip_gen: v7x
topology: tpu7x:2x2x1
jax: 0.10.0
libtpu: 0.0.40
codegen_flags: <defaults>
</compile_context>

<pallas_src>
import functools

import jax
import jax.numpy as jnp
from jax import lax
from jax.experimental import pallas as pl
from jax.experimental.pallas import tpu as pltpu


def _round_up(x, m):
    return (x + m - 1) // m * m


def _make_block_kernel(hw_real):
    """Kernel specialised on the un-padded spatial size (for lane masking)."""

    def block_kernel(x_ref, w_ref, prm_ref, p_ref, o_ref):
        # x_ref  : (1, K_pad, HW_pad) bf16  im2col slab for one batch element
        # w_ref  : (CT, K_pad)        bf16  weight-standardized filters (tile)
        # prm_ref: (1, CT, 3)         f32   [group-centered bias, eff_gamma, eff_beta]
        # p_ref  : (CT, CT)           f32   group projection, rows scaled 1/(cpg*HW)
        # o_ref  : (1, CT, HW_pad)
        x = x_ref[0]                                                  # (K_pad, HW_pad) bf16

        # --- 3x3 conv as one fused MXU matmul, f32 accumulation ---
        y = jnp.dot(w_ref[...], x, preferred_element_type=jnp.float32)   # (CT, HW_pad)

        prm = prm_ref[0]                                              # (CT, 3) f32
        dbias = prm[:, 0:1]                                           # bias - group_mean(bias)
        gamma = prm[:, 1:2]
        beta = prm[:, 2:3]
        p = p_ref[...]                                                # (CT, CT) f32

        # --- GroupNorm stats: reduce over HW FIRST, then a tiny group matmul ---
        # Padded HW lanes (and padded K rows) of y are exactly zero, so the raw
        # lane-sum needs no mask.
        s1 = jnp.sum(y, axis=1, keepdims=True)                        # (CT, 1)
        mean_c = jnp.dot(p, s1, preferred_element_type=jnp.float32)   # per-channel group mean

        # Centered conv-plus-bias (bias enters as its group-centered delta).
        d = (y - mean_c) + dbias                                      # (CT, HW_pad)

        hw_pad = y.shape[1]
        if hw_real != hw_pad:
            lane = lax.broadcasted_iota(jnp.int32, y.shape, 1)
            d_stat = jnp.where(lane < hw_real, d, 0.0)
        else:
            d_stat = d
        s2 = jnp.sum(d_stat * d_stat, axis=1, keepdims=True)          # (CT, 1)
        var_c = jnp.dot(p, s2, preferred_element_type=jnp.float32)    # per-channel group var

        scale = lax.rsqrt(var_c + 1e-5) * gamma                       # (CT, 1)
        z = d * scale + beta                                          # (CT, HW_pad) f32

        # --- SiLU ---
        o_ref[0] = (z * jax.nn.sigmoid(z)).astype(o_ref.dtype)

    return block_kernel


def _pick_channel_tile(cout, groups, max_tile=128):
    """Largest channel tile that (a) holds whole GroupNorm groups, (b) divides
    Cout exactly, and (c) is sublane-sliceable (multiple of 8, prefer 16) when
    it is not the full channel extent."""
    cpg = max(1, cout // groups)
    cands = [ct for ct in range(cpg, cout + 1, cpg) if cout % ct == 0]
    legal = [ct for ct in cands if ct == cout or ct % 8 == 0]
    fitting = [ct for ct in legal if ct <= max_tile]
    if fitting:
        pref16 = [ct for ct in fitting if ct % 16 == 0 or ct == cout]
        return max(pref16) if pref16 else max(fitting)
    return cout  # no small legal tile -> single tile of all channels


def block_forward(x_nchw, weight, bias, gamma, beta, groups=8, scale_shift=None,
                  out_dtype=None):
    """Equivalent of Block.forward(x, scale_shift). x is NCHW, weight OIHW."""
    N, Cin, H, W = x_nchw.shape
    Cout = weight.shape[0]
    HW = H * W
    HW_pad = _round_up(HW, 128)
    cpg = Cout // groups
    out_dtype = x_nchw.dtype if out_dtype is None else out_dtype

    # --- chip info (VMEM capacity drives tile size and the scoped limit) ---
    try:
        cap = int(getattr(pltpu.get_tpu_info(), "vmem_capacity_bytes", 0)) or (64 << 20)
    except Exception:  # pragma: no cover - conservative fallback
        cap = 64 << 20
    max_tile = 256 if (cap >= (100 << 20) and Cout >= 256) else 128

    # --- weight standardization (per output filter, biased var, f32 eps) ---
    w = weight.astype(jnp.float32)
    w_mean = jnp.mean(w, axis=(1, 2, 3), keepdims=True)
    w_var = jnp.var(w, axis=(1, 2, 3), keepdims=True)
    w_std = (w - w_mean) * lax.rsqrt(w_var + 1e-5)
    # (Cout, Cin, 3, 3) -> (Cout, 3, 3, Cin) -> (Cout, 9*Cin)
    K = 9 * Cin
    K_pad = _round_up(K, 16) if K >= 128 else 128   # bf16 sublane granule / MXU depth
    w_mat = jnp.transpose(w_std, (0, 2, 3, 1)).reshape(Cout, K)
    if K_pad != K:
        w_mat = jnp.pad(w_mat, ((0, 0), (0, K_pad - K)))
    w_mat = w_mat.astype(jnp.bfloat16)

    # --- im2col in channels-first order: (N, K, HW), zero-padded to (N, K_pad, HW_pad) ---
    xp = jnp.pad(x_nchw, ((0, 0), (0, 0), (1, 1), (1, 1)))
    taps = [xp[:, :, kh:kh + H, kw:kw + W].reshape(N, Cin, HW)
            for kh in range(3) for kw in range(3)]
    x_cols = jnp.concatenate(taps, axis=1)
    x_cols = jnp.pad(x_cols, ((0, 0), (0, K_pad - K), (0, HW_pad - HW)))
    x_cols = x_cols.astype(jnp.bfloat16)                               # (N, K_pad, HW_pad)

    # --- packed per-channel parameters: [group-centered bias, eff_gamma, eff_beta] ---
    b32 = bias.astype(jnp.float32)
    b_grp_mean = jnp.mean(b32.reshape(groups, cpg), axis=1, keepdims=True)
    delta_bias = (b32.reshape(groups, cpg) - b_grp_mean).reshape(Cout)

    g32 = gamma.astype(jnp.float32)[None, :]
    bt32 = beta.astype(jnp.float32)[None, :]
    if scale_shift is not None:
        scale, shift = scale_shift
        scale = scale.reshape(N, Cout).astype(jnp.float32)
        shift = shift.reshape(N, Cout).astype(jnp.float32)
        eff_gamma = g32 * (scale + 1.0)
        eff_beta = bt32 * (scale + 1.0) + shift
    else:
        eff_gamma = jnp.broadcast_to(g32, (N, Cout))
        eff_beta = jnp.broadcast_to(bt32, (N, Cout))
    params = jnp.stack(
        [jnp.broadcast_to(delta_bias[None, :], (N, Cout)), eff_gamma, eff_beta],
        axis=-1)                                                       # (N, Cout, 3) f32

    # --- channel tiling + group projection (1/(cpg*HW) folded in) ---
    CT = _pick_channel_tile(Cout, groups, max_tile=max_tile)
    n_ct = Cout // CT
    gid = jnp.arange(CT) // cpg
    proj = (gid[:, None] == gid[None, :]).astype(jnp.float32) / float(cpg * HW)

    # --- VMEM budget: double-buffered blocks + live f32 temporaries ---
    out_elt = jnp.dtype(out_dtype).itemsize
    x_blk = K_pad * HW_pad * 2
    w_blk = CT * K_pad * 2
    prm_blk = CT * 128 * 4
    proj_blk = CT * max(CT, 128) * 4
    out_blk = CT * HW_pad * out_elt
    f32_tmp = 6 * CT * HW_pad * 4
    need = 2 * (x_blk + w_blk + prm_blk + proj_blk + out_blk) + f32_tmp + (2 << 20)
    vmem_limit = int(min(int(0.85 * cap), max(need, 16 << 20)))

    out = pl.pallas_call(
        _make_block_kernel(HW),
        out_shape=jax.ShapeDtypeStruct((N, Cout, HW_pad), out_dtype),
        grid_spec=pltpu.PrefetchScalarGridSpec(
            num_scalar_prefetch=0,
            grid=(N, n_ct),
            in_specs=[
                pl.BlockSpec((1, K_pad, HW_pad), lambda n, j: (n, 0, 0)),  # x_cols
                pl.BlockSpec((CT, K_pad), lambda n, j: (j, 0)),            # weights
                pl.BlockSpec((1, CT, 3), lambda n, j: (n, j, 0)),          # packed params
                pl.BlockSpec((CT, CT), lambda n, j: (0, 0)),               # group proj
            ],
            out_specs=pl.BlockSpec((1, CT, HW_pad), lambda n, j: (n, j, 0)),
        ),
        compiler_params=pltpu.CompilerParams(
            dimension_semantics=("parallel", "parallel"),
            vmem_limit_bytes=vmem_limit),
    )(x_cols, w_mat, params, proj)

    if HW_pad != HW:
        out = out[:, :, :HW]
    return out.reshape(N, Cout, H, W)


def reference_forward(x, weight, bias, gamma, beta, groups=8, scale_shift=None):
    """Pure-JAX f32 reference of the torch Block."""
    w = weight.astype(jnp.float32)
    m = jnp.mean(w, axis=(1, 2, 3), keepdims=True)
    v = jnp.var(w, axis=(1, 2, 3), keepdims=True)
    wn = (w - m) * lax.rsqrt(v + 1e-5)
    y = lax.conv_general_dilated(x, wn, (1, 1), ((1, 1), (1, 1)),
                                 dimension_numbers=('NCHW', 'OIHW', 'NCHW'))
    y = y + bias[None, :, None, None]
    N, C, H, W = y.shape
    yg = y.reshape(N, groups, C // groups, H, W)
    gm = jnp.mean(yg, axis=(2, 3, 4), keepdims=True)
    gv = jnp.var(yg, axis=(2, 3, 4), keepdims=True)
    yn = ((yg - gm) * lax.rsqrt(gv + 1e-5)).reshape(N, C, H, W)
    z = yn * gamma[None, :, None, None] + beta[None, :, None, None]
    if scale_shift is not None:
        scale, shift = scale_shift
        z = z * (scale.reshape(N, C, 1, 1) + 1.0) + shift.reshape(N, C, 1, 1)
    return z * jax.nn.sigmoid(z)


def _check(out, ref, name):
    assert out.shape == ref.shape, (name, out.shape, ref.shape)
    err = float(jnp.max(jnp.abs(out - ref)))
    assert jnp.allclose(out, ref, rtol=5e-2, atol=5e-2), (name, err)


if __name__ == "__main__":
    key = jax.random.PRNGKey(0)

    # --- test 1: Block(dim=4, dim_out=32, groups=8), 16x16 (lane-aligned HW) ---
    N, Cin, H, W = 2, 4, 16, 16
    Cout, groups = 32, 8
    kx, kw, kb, ks, kh = jax.random.split(key, 5)
    x = jax.random.normal(kx, (N, Cin, H, W), jnp.float32)
    weight = jax.random.normal(kw, (Cout, Cin, 3, 3), jnp.float32) * 0.1
    bias = jax.random.normal(kb, (Cout,), jnp.float32) * 0.1
    gamma = jnp.ones((Cout,), jnp.float32)   # nn.GroupNorm default affine init
    beta = jnp.zeros((Cout,), jnp.float32)

    out = jax.block_until_ready(block_forward(x, weight, bias, gamma, beta, groups=groups))
    _check(out, reference_forward(x, weight, bias, gamma, beta, groups=groups), "base")

    # time-embedding scale_shift path
    scale = jax.random.normal(ks, (N, Cout, 1, 1), jnp.float32) * 0.1
    shift = jax.random.normal(kh, (N, Cout, 1, 1), jnp.float32) * 0.1
    out2 = jax.block_until_ready(
        block_forward(x, weight, bias, gamma, beta, groups=groups,
                      scale_shift=(scale, shift)))
    _check(out2, reference_forward(x, weight, bias, gamma, beta, groups=groups,
                                   scale_shift=(scale, shift)), "scale_shift")

    # --- test 2: non-128-multiple HW (14x14) + larger Cin -> exercises HW/K padding ---
    N2, Cin2, H2, W2 = 2, 16, 14, 14
    k2 = jax.random.split(key, 3)
    x2 = jax.random.normal(k2[0], (N2, Cin2, H2, W2), jnp.float32)
    weight2 = jax.random.normal(k2[1], (Cout, Cin2, 3, 3), jnp.float32) * 0.1
    bias2 = jax.random.normal(k2[2], (Cout,), jnp.float32) * 0.1
    out3 = jax.block_until_ready(
        block_forward(x2, weight2, bias2, gamma, beta, groups=groups))
    _check(out3, reference_forward(x2, weight2, bias2, gamma, beta, groups=groups),
           "padded_hw")

    print("KERNEL_OK")
</pallas_src>

<mosaic_0001>
module attributes {stable_mosaic.version = 11 : i64} {
  func.func @block_kernel(%arg0: i32, %arg1: i32, %arg2: memref<1x128x256xbf16, #tpu.memory_space<vmem>>, %arg3: memref<32x128xbf16, #tpu.memory_space<vmem>>, %arg4: memref<1x32x3xf32, #tpu.memory_space<vmem>>, %arg5: memref<32x32xf32, #tpu.memory_space<vmem>>, %arg6: memref<1x32x256xf32, #tpu.memory_space<vmem>>) attributes {dimension_semantics = [#tpu.dimension_semantics<parallel>, #tpu.dimension_semantics<parallel>], iteration_bounds = array<i64: 2, 1>, scalar_prefetch = 0 : i64, scratch_operands = 0 : i64, tpu.core_type = #tpu.core_type<tc>, window_params = [{transform_indices = @transform_0, window_bounds = array<i64: 1, 128, 256>}, {transform_indices = @transform_1, window_bounds = array<i64: 32, 128>}, {transform_indices = @transform_2, window_bounds = array<i64: 1, 32, 3>}, {pipeline_mode = #tpu.pipeline_mode<synchronous>, transform_indices = @transform_3, window_bounds = array<i64: 32, 32>}, {transform_indices = @transform_4, window_bounds = array<i64: 1, 32, 256>}]} {
    %c0 = arith.constant 0 : index
    %c0_0 = arith.constant 0 : index
    %c0_1 = arith.constant 0 : index
    %0 = vector.load %arg2[%c0, %c0_0, %c0_1] : memref<1x128x256xbf16, #tpu.memory_space<vmem>>, vector<1x128x256xbf16>
    %1 = vector.shape_cast %0 : vector<1x128x256xbf16> to vector<128x256xbf16>
    %c0_2 = arith.constant 0 : index
    %c0_3 = arith.constant 0 : index
    %2 = vector.load %arg3[%c0_2, %c0_3] : memref<32x128xbf16, #tpu.memory_space<vmem>>, vector<32x128xbf16>
    %cst = arith.constant dense<0.000000e+00> : vector<32x256xf32>
    %3 = tpu.matmul %2, %1, %cst {dimension_numbers = #tpu.dot_dimension_numbers<[1], [0], [0], [1], [0, 0, 1, 1], [], []>} : vector<32x128xbf16>, vector<128x256xbf16>, vector<32x256xf32> -> vector<32x256xf32>
    %c0_4 = arith.constant 0 : index
    %c0_5 = arith.constant 0 : index
    %c0_6 = arith.constant 0 : index
    %4 = vector.load %arg4[%c0_4, %c0_5, %c0_6] : memref<1x32x3xf32, #tpu.memory_space<vmem>>, vector<1x32x3xf32>
    %5 = vector.shape_cast %4 : vector<1x32x3xf32> to vector<32x3xf32>
    %6 = vector.extract_strided_slice %5 {offsets = [0, 0], sizes = [32, 1], strides = [1, 1]} : vector<32x3xf32> to vector<32x1xf32>
    %7 = vector.extract_strided_slice %5 {offsets = [0, 1], sizes = [32, 1], strides = [1, 1]} : vector<32x3xf32> to vector<32x1xf32>
    %8 = vector.extract_strided_slice %5 {offsets = [0, 2], sizes = [32, 1], strides = [1, 1]} : vector<32x3xf32> to vector<32x1xf32>
    %c0_7 = arith.constant 0 : index
    %c0_8 = arith.constant 0 : index
    %9 = vector.load %arg5[%c0_7, %c0_8] : memref<32x32xf32, #tpu.memory_space<vmem>>, vector<32x32xf32>
    %cst_9 = arith.constant dense<0.000000e+00> : vector<32xf32>
    %10 = vector.multi_reduction <add>, %3, %cst_9 [1] : vector<32x256xf32> to vector<32xf32>
    %11 = vector.shape_cast %10 : vector<32xf32> to vector<32x1xf32>
    %cst_10 = arith.constant dense<0.000000e+00> : vector<32x1xf32>
    %12 = tpu.matmul %9, %11, %cst_10 {dimension_numbers = #tpu.dot_dimension_numbers<[1], [0], [0], [1], [0, 0, 1, 1], [], []>} : vector<32x32xf32>, vector<32x1xf32>, vector<32x1xf32> -> vector<32x1xf32>
    %13 = vector.broadcast %12 : vector<32x1xf32> to vector<32x256xf32>
    %14 = arith.subf %3, %13 : vector<32x256xf32>
    %15 = vector.broadcast %6 : vector<32x1xf32> to vector<32x256xf32>
    %16 = arith.addf %14, %15 : vector<32x256xf32>
    %17 = arith.mulf %16, %16 : vector<32x256xf32>
    %cst_11 = arith.constant dense<0.000000e+00> : vector<32xf32>
    %18 = vector.multi_reduction <add>, %17, %cst_11 [1] : vector<32x256xf32> to vector<32xf32>
    %19 = vector.shape_cast %18 : vector<32xf32> to vector<32x1xf32>
    %cst_12 = arith.constant dense<0.000000e+00> : vector<32x1xf32>
    %20 = tpu.matmul %9, %19, %cst_12 {dimension_numbers = #tpu.dot_dimension_numbers<[1], [0], [0], [1], [0, 0, 1, 1], [], []>} : vector<32x32xf32>, vector<32x1xf32>, vector<32x1xf32> -> vector<32x1xf32>
    %cst_13 = arith.constant 9.99999974E-6 : f32
    %21 = vector.broadcast %cst_13 : f32 to vector<32x1xf32>
    %22 = arith.addf %20, %21 : vector<32x1xf32>
    %23 = math.rsqrt %22 : vector<32x1xf32>
    %24 = arith.mulf %23, %7 : vector<32x1xf32>
    %25 = vector.broadcast %24 : vector<32x1xf32> to vector<32x256xf32>
    %26 = arith.mulf %16, %25 : vector<32x256xf32>
    %27 = vector.broadcast %8 : vector<32x1xf32> to vector<32x256xf32>
    %28 = arith.addf %26, %27 : vector<32x256xf32>
    %29 = arith.negf %28 : vector<32x256xf32>
    %30 = math.exp %29 : vector<32x256xf32>
    %cst_14 = arith.constant 1.000000e+00 : f32
    %31 = vector.broadcast %cst_14 : f32 to vector<32x256xf32>
    %32 = arith.addf %31, %30 : vector<32x256xf32>
    %33 = arith.divf %31, %32 : vector<32x256xf32>
    %34 = arith.mulf %28, %33 : vector<32x256xf32>
    %c0_15 = arith.constant 0 : index
    %c0_16 = arith.constant 0 : index
    %c0_17 = arith.constant 0 : index
    %35 = vector.load %arg6[%c0_15, %c0_16, %c0_17] : memref<1x32x256xf32, #tpu.memory_space<vmem>>, vector<1x32x256xf32>
    %36 = vector.shape_cast %35 : vector<1x32x256xf32> to vector<32x256xf32>
    %37 = vector.shape_cast %34 : vector<32x256xf32> to vector<1x32x256xf32>
    tpu.vector_store %arg6[%c0_15, %c0_16, %c0_17], %37 {strides = array<i32>} : memref<1x32x256xf32, #tpu.memory_space<vmem>>, vector<1x32x256xf32>,
    return
  }
  func.func @transform_0(%arg0: i32, %arg1: i32) -> (i32, i32, i32) {
    %c0_i32 = arith.constant 0 : i32
    %c0_i32_0 = arith.constant 0 : i32
    %c0_i32_1 = arith.constant 0 : i32
    return %arg0, %c0_i32, %c0_i32_0 : i32, i32, i32
  }
  func.func @transform_1(%arg0: i32, %arg1: i32) -> (i32, i32) {
    %c0_i32 = arith.constant 0 : i32
    %c0_i32_0 = arith.constant 0 : i32
    return %arg1, %c0_i32 : i32, i32
  }
  func.func @transform_2(%arg0: i32, %arg1: i32) -> (i32, i32, i32) {
    %c0_i32 = arith.constant 0 : i32
    %c0_i32_0 = arith.constant 0 : i32
    return %arg0, %arg1, %c0_i32 : i32, i32, i32
  }
  func.func @transform_3(%arg0: i32, %arg1: i32) -> (i32, i32) {
    %c0_i32 = arith.constant 0 : i32
    %c0_i32_0 = arith.constant 0 : i32
    %c0_i32_1 = arith.constant 0 : i32
    return %c0_i32, %c0_i32_0 : i32, i32
  }
  func.func @transform_4(%arg0: i32, %arg1: i32) -> (i32, i32, i32) {
    %c0_i32 = arith.constant 0 : i32
    %c0_i32_0 = arith.constant 0 : i32
    return %arg0, %arg1, %c0_i32 : i32, i32, i32
  }
}

</mosaic_0001>

<bundles_post_ra>
// kernel: tpu_custom_call.1
= control target key start
LH: loop header
LB: loop body
LE: loop exit
PB: predicated region body
PF: predicated region fallthrough
CT: control target
= control target key end

     0   :  { %9 = vsyncpa [#allocation3], 0  ;;  %s1737_s0 = inlined_call_operand.hbm [shape: bf16[2,128,256], index: 0, kind: input, shape index: {}]   ;;  %s1738_s1 = inlined_call_operand.vmem [shape: bf16[32,128], index: 1, kind: input, shape index: {}]   ;;  %s1739_s2 = inlined_call_operand.vmem [shape: f32[2,32,3], index: 2, kind: input, shape index: {}]   ;;  %s1740_s3 = inlined_call_operand.vmem [shape: f32[32,32], index: 3, kind: input, shape index: {}]   ;;  %s1741_s4 = inlined_call_operand.hbm [shape: f32[2,32,256], index: 4, kind: output, shape index: {}]  }
   0x1   :  { %11 = vsyncpa [#allocation3 + $0x1], 0 }
   0x2   :  { %12 = vsyncpa [#allocation4], 0 }
   0x3   :  { %14 = vsyncpa [#allocation4 + $0x1], 0  ;;  %s1410_s15 = smov 0   ;;  %s1412_s16 = smov 0  }
   0x4   :  { %s1414_s17 = smov 0   ;;  %s1416_s18 = smov 0  }
   0x5   :  { %s1418_s19 = smov 0   ;;  %s1420_s20 = smov 0  }
   0x6 LB: > { %s1004_s21 = sadd.s32 4294967295, %s1374_s20   ;;  %s1005_s22 = sadd.s32 4294967294, %s1374_s20   ;;  %s1374_s20 = sphi %s1420_s20, %s20_s20   ;;  %s1370_s19 = sphi %s1418_s19, %s1756_s19   ;;  %s1366_s18 = sphi %s1416_s18, %s1755_s18   ;;  %s1362_s17 = sphi %s1414_s17, %s1754_s17   ;;  %s1358_s16 = sphi %s1412_s16, %s1753_s16   ;;  %s1354_s15 = sphi %s1410_s15, %s1752_s15  }
   0x7   : > { %s32_s23 = sadd.s32 1, %s1370_s19  ;;  %s39_s24 = sadd.s32 1, %s1362_s17 }
   0x8   : > { %p34_p0 = scmp.ge.s32.totalorder %s32_s23, 2  ;;  %p46_p1 = scmp.ne.s32.totalorder %s1362_s17, %s1358_s16 }
   0x9   : > { %p47_p2 = scmp.eq.s32.totalorder %s1374_s20, 0  ;;  %p52_p3 = scmp.ne.s32.totalorder %s1358_s16, %s1354_s15 }
   0xa   : > { %s1758_s23 = smov (%p34_p0, %s32_s23), 0  ;;  %p53_p5 = scmp.eq.s32.totalorder %s1004_s21, 0 }
   0xb   : > { %p1451_p4 = por %p47_p2, %p46_p1  ;;  %s36_s26 = ssub.s32 %s1370_s19, %s1758_s23 }
   0xc   : > { %p153_p6 = scmp.eq.s32.totalorder %s1004_s21, 1  ;;  %p37_p7 = scmp.eq.s32.totalorder %s36_s26, 0 }
   0xd   : > { %p1457_p8 = por %p53_p5, %p52_p3  ;;  %p159_p10 = scmp.eq.s32.totalorder %s1005_s22, 1 }
   0xe   : > { %p1461_p9 = por %p153_p6, %p46_p1  ;;  %p1131_p13 = scmp.lt.s32.totalorder %s1374_s20, 2 }
   0xf   : > { %s1466_s29 = scalar_select %p37_p7, %s1362_s17, %s39_s24  }
  0x10   : > { %s1745_s28 = scalar_select %p1461_p9, 1, 0 }
  0x11   : > { %p1468_p11 = por %p159_p10, %p52_p3  ;;  %s191_s5 = sand.u32 1, %s1362_s17  }
  0x12   : > { %s1009_s6 = sshll.u32 %s191_s5, 7  ;;  %s1056_s7 = sshll.u32 %s1370_s19, 11 }
  0x13   : > { %s1746_s30 = scalar_select %p1468_p11, 1, 0 }
  0x14   : > { %s1479_s10 = scalar_lea.hbm %s1737_s0, %s1056_s7  ;;  %s195_s11 = scalar_lea.vmem [#allocation2], %s1009_s6 }
  0x15   : > { %s202_s12 = sshll.u32 %s195_s11, 4  ;;  %p1485_p0 = pnand %p1131_p13, %p1451_p4  ;;  %s1481_s12 = int_to_ptr.vmem [resolvable:$true] %s202_s12 }
  0x16   : > { %s1490_s14 = scalar_lea.sflag [#allocation3], %s191_s5  ;;  %s1262_s21 = scalar_lea.hbm %s1479_s10, 2048 }
  0x17   : > { %p1263_p2 = scmp.ne.s32.totalorder %s1479_s10, %s1262_s21  ;;  %p1264_p3 = pneg %p1485_p0 }
  0x18   : > { %s1267_s25 = scalar_lea.hbm %s1737_s0, 4096  ;;  %p1268_p4 = scmp.lt.u32.totalorder %s1479_s10, %s1737_s0 }
  0x19   : > { %p1265_p5 = pnand %p1264_p3, %p1263_p2  ;;  %p1269_p7 = scmp.lt.u32.totalorder %s1267_s25, %s1262_s21 }
  0x1a   : > { %p1271_p13 = scmp.lt.u32.totalorder %s1262_s21, %s1479_s10 }
  0x1b   : > { %p1266_p6 = pneg %p1265_p5  ;;  %p1270_p10 = por %p1269_p7, %p1268_p4 }
  0x1d   : > { %p1272_p12 = por %p1271_p13, %p1270_p10 }
  0x1f   : > { %p1273_p1 = pnand %p1272_p12, %p1266_p6 }
  0x21   : > { %1276 = shalt.err (!%p1273_p1)
}
  0x22   : > { %s1277_s5 = scalar_lea.vmem %s1481_s12, 2048  ;;  %s1376_s7 = smov [#allocation2]  }
  0x23   : > { %p1278_p2 = scmp.ne.s32.totalorder %s1481_s12, %s1277_s5  ;;  %s1282_s8 = sshll.u32 %s1376_s7, 4  ;;  %s1283_s8 = int_to_ptr.vmem [resolvable:$false] %s1282_s8 }
  0x24   : > { %s1284_s9 = scalar_lea.vmem %s1283_s8, 4096  ;;  %p1285_p9 = scmp.lt.s32.totalorder %s1481_s12, %s1283_s8 }
  0x25   : > { %p1280_p5 = pnand %p1278_p2, %p1264_p3  ;;  %p1286_p4 = scmp.lt.s32.totalorder %s1284_s9, %s1277_s5 }
  0x27   : > { %p1281_p11 = pneg %p1280_p5  ;;  %p1287_p7 = por %p1286_p4, %p1285_p9 }
  0x29   : > { %p1288_p10 = pnand %p1287_p7, %p1281_p11 }
  0x2b   : > { %1291 = shalt.err (!%p1288_p10)
}
  0x2c   : > { %s1377_s11 = smov 128   ;;  %s1378_s21 = smov 8  }
  0x2d   : > { %1126 = dma.hbm_to_vmem [thread:$0]  (!%p1485_p0), %s1479_s10, 2048, %s1481_s12, %s1490_s14, %s1377_s11, %s1377_s11, %s1378_s21  }
  0x2e   : > { %p223_p12 = scmp.lt.s32.totalorder %s1374_s20, 3  ;;  %p1748_p1 = scmp.ge.s32.totalorder %s1374_s20, 1 }
  0x30   : > { %p224_p3 = pnand %p1748_p1, %p223_p12 }
  0x31   : > { %s1522_s22 = sand.u32 (!%p224_p3), 1, %s1358_s16  }
  0x32   : > { %227 = sbr.rel (%p224_p3) target bundleno = 1404 (0x57c), region = 36  ;;  %s1013_s24 = sshll.u32 (!%p224_p3), %s1522_s22, 7 }
  0x33   : > { %s230_s25 = scalar_lea.sflag (!%p224_p3), [#allocation3], %s1522_s22  ;;  %s1526_s26 = scalar_lea.vmem (!%p224_p3), [#allocation2], %s1013_s24 }
  0x39   : > { %1345 = dma.done.wait (%p1457_p8), %s230_s25, 2048  }
  0x3a   : > { %1347 = vsyncadd (%p1457_p8), %s230_s25, 4294965248  ;;  %v1379_v0 = vmov 0   ;;  %v1196_v1 = vld [vmem:[%s1526_s26 + $0x4] ss:$8 sps:$4 sm:$0xff]   ;;  %v1198_v2 = vld [vmem:[%s1526_s26] ss:$8 sps:$4 sm:$0xff]  }
  0x3b   : > { %434 = vmatprep.mubr.bf16.mxu0 %v1379_v0  ;;  %1189 = vset.pattern.permute.xlu1 %v1379_v0  ;;  %v1199_v3 = vld [vmem:[%s1526_s26 + $0x14] ss:$8 sps:$4 sm:$0xff]   ;;  %v1201_v4 = vld [vmem:[%s1526_s26 + $0x10] ss:$8 sps:$4 sm:$0xff]   ;;  %v1202_v5 = vld [vmem:[%s1526_s26 + $0x24] ss:$8 sps:$4 sm:$0xff]  }
  0x3c   : > { %1188 = vset.pattern.permute.xlu0 %v1379_v0  ;;  %402 = vmatprep.subr.bf16.mxu0 %v1196_v1  ;;  %v1204_v6 = vld [vmem:[%s1526_s26 + $0x20] ss:$8 sps:$4 sm:$0xff]   ;;  %v1205_v7 = vld [vmem:[%s1526_s26 + $0x34] ss:$8 sps:$4 sm:$0xff]   ;;  %v1207_v8 = vld [vmem:[%s1526_s26 + $0x30] ss:$8 sps:$4 sm:$0xff]  }
  0x3d   : > { %403 = vmatpush1.bf16.msra.mxu0 %v1198_v2  ;;  %v1208_v9 = vld [vmem:[%s1526_s26 + $0x44] ss:$8 sps:$4 sm:$0xff]   ;;  %v1210_v10 = vld [vmem:[%s1526_s26 + $0x40] ss:$8 sps:$4 sm:$0xff]   ;;  %v1211_v11 = vld [vmem:[%s1526_s26 + $0x54] ss:$8 sps:$4 sm:$0xff]  }
  0x3e   : > { %404 = vmatprep.subr.bf16.mxu0 %v1199_v3  ;;  %v1213_v12 = vld [vmem:[%s1526_s26 + $0x50] ss:$8 sps:$4 sm:$0xff]   ;;  %v1214_v13 = vld [vmem:[%s1526_s26 + $0x64] ss:$8 sps:$4 sm:$0xff]   ;;  %v1216_v14 = vld [vmem:[%s1526_s26 + $0x60] ss:$8 sps:$4 sm:$0xff]  }
  0x3f   : > { %v1217_v15 = vld [vmem:[%s1526_s26 + $0x74] ss:$8 sps:$4 sm:$0xff]   ;;  %v1219_v16 = vld [vmem:[%s1526_s26 + $0x70] ss:$8 sps:$4 sm:$0xff]   ;;  %v1220_v17 = vld [vmem:[%s1738_s1] sm:$0xff]   ;;  %vm475_vm0 = vcmask 261120  }
  0x40   : > { %v1221_v18 = vld [vmem:[%s1738_s1 + $0x8] sm:$0xff]   ;;  %v459_v31 = vld [vmem:[%s1740_s3] sm:$0xff]  ;;  %v1588_v39 = vld [vmem:[%s1740_s3 + $0x10] sm:$0xff]  ;;  %p279_p8 = scmp.lt.s32.totalorder %s1366_s18, 1  ;;  %s1380_s12 = smov 127  }
  0x41   : > { %405 = vmatpush1.bf16.msra.mxu0 %v1201_v4  ;;  %1083 = vmatprep.mubr.msk.f32.mxu1 %vm475_vm0, %v459_v31  ;;  %v1583_v38 = vld [vmem:[%s1740_s3 + $0x8] sm:$0xff]  ;;  %v1597_v40 = vld [vmem:[%s1740_s3 + $0x18] sm:$0xff]  ;;  %s1014_s13 = sshll.u32 %s1522_s22, 6  ;;  %s1058_s6 = sshll.u32 %s1366_s18, 10 }
  0x42   : > { %406 = vmatprep.subr.bf16.mxu0 %v1202_v5  ;;  %s280_s24 = scalar_select %p279_p8, %s1366_s18, 1 }
  0x43   : > { %s271_s14 = scalar_lea.vmem [#allocation5], %s1014_s13  ;;  %s1686_s9 = scalar_lea.hbm %s1741_s4, %s1058_s6 }
  0x44   : > { %s1057_s25 = sshll.u32 %s280_s24, 5  ;;  %s887_s5 = sshll.u32 %s271_s14, 4  ;;  %s1688_s5 = int_to_ptr.vmem [resolvable:$true] %s887_s5 }
  0x45   : > { %407 = vmatpush1.bf16.msra.mxu0 %v1204_v6  ;;  %s286_s10 = scalar_lea.vmem %s1739_s2, %s1057_s25  ;;  %s871_s11 = scalar_lea.sflag [#allocation4], %s1522_s22 }
  0x46   : > { %408 = vmatprep.subr.bf16.mxu0 %v1205_v7  ;;  %v1607_v43 = vld [vmem:[%s286_s10] sm:$0xff]  ;;  %v1610_v46 = vld [vmem:[%s286_s10 + $0x8] sm:$0xff]  ;;  %v1613_v47 = vld [vmem:[%s286_s10 + $0x10] sm:$0xff]  ;;  %s1292_s18 = scalar_lea.vmem %s1688_s5, 1024  ;;  %p1749_p11 = scmp.ne.s32.totalorder %s1745_s28, 0 }
  0x47   : > { %v1616_v48 = vld [vmem:[%s286_s10 + $0x18] sm:$0xff]  ;;  %p1293_p9 = scmp.ne.s32.totalorder %s1688_s5, %s1292_s18  ;;  %s1382_s21 = smov [#allocation5]  }
  0x48   : > { %s1296_s24 = sshll.u32 %s1382_s21, 4  ;;  %s1297_s24 = int_to_ptr.vmem [resolvable:$false] %s1296_s24 }
  0x49   : > { %409 = vmatpush1.bf16.msra.mxu0 %v1207_v8  ;;  %p1294_p0 = pnand %p1293_p9, %p1749_p11  ;;  %s1298_s25 = scalar_lea.vmem %s1297_s24, 2048 }
  0x4a   : > { %410 = vmatprep.subr.bf16.mxu0 %v1208_v9  ;;  %p1299_p13 = scmp.lt.s32.totalorder %s1688_s5, %s1297_s24  ;;  %p1300_p2 = scmp.lt.s32.totalorder %s1298_s25, %s1292_s18 }
  0x4b   : > { %p1295_p6 = pneg %p1294_p0 }
  0x4c   : > { %p1301_p5 = por %p1300_p2, %p1299_p13 }
  0x4d   : > { %411 = vmatpush1.bf16.msra.mxu0 %v1210_v10 }
  0x4e   : > { %412 = vmatprep.subr.bf16.mxu0 %v1211_v11  ;;  %p1302_p4 = pnand %p1301_p5, %p1295_p6 }
  0x51   : > { %413 = vmatpush1.bf16.msra.mxu0 %v1213_v12 }
  0x52   : > { %414 = vmatprep.subr.bf16.mxu0 %v1214_v13 }
  0x55   : > { %415 = vmatpush1.bf16.msra.mxu0 %v1216_v14 }
  0x56   : > { %416 = vmatprep.subr.bf16.mxu0 %v1217_v15 }
  0x59   : > { %417 = vmatpush1.bf16.msra.mxu0 %v1219_v16 }
  0x5c   : > { %435 = vmatmul.mubr.bf16.vlgmr.msra.gmra.mrb[0].mxu0 %v1220_v17 }
  0x5d   : > { %444 = vmatprep.mubr.bf16.mxu0 %v1379_v0 }
  0x64   : > { %445 = vmatmul.mubr.bf16.gmra.mrb[4].mxu0 %v1221_v18 }
 0x12f   : > { %v436_v19 = vpop.f32.mrb[0].mxu0 }
 0x130   : > { %v438_v20 = vpop.f32.mrb[1].mxu0 }
 0x131   : > { %v1558_v21 = vpop.f32.mrb[2].mxu0  ;;  %v463_v22 = vadd.f32 %v438_v20, %v436_v19 }
 0x132   : > { %v1560_v23 = vpop.f32.mrb[3].mxu0 }
 0x133   : > { %464 = vadd.xlane.f32.xlu0 %v463_v22  ;;  %v466_v24 = vadd.f32 %v1560_v23, %v1558_v21 }
 0x137   : > { %467 = vadd.xlane.f32.xlu0 %v466_v24  ;;  %v1564_v25 = vpop.f32.mrb[4].mxu0 }
 0x138   : > { %v1566_v26 = vpop.f32.mrb[5].mxu0 }
 0x139   : > { %v1568_v27 = vpop.f32.mrb[6].mxu0  ;;  %v469_v28 = vadd.f32 %v1566_v26, %v1564_v25 }
 0x13a   : > { %v1572_v29 = vpop.f32.mrb[7].mxu0 }
 0x13b   : > { %v472_v30 = vadd.f32 %v1572_v29, %v1568_v27  ;;  %470 = vadd.xlane.f32.xlu1 %v469_v28  ;;  %v1381_v28 = vmov 2  }
 0x13f   : > { %473 = vadd.xlane.f32.xlu1 %v472_v30 }
 0x1c0   : > { %v465_v32 = vpop.xlane.xlu0 %464 }
 0x1c4   : > { %v468_v33 = vpop.xlane.xlu0 %467 }
 0x1c5   : > { %v1103_v34 = vpack.c.bf16 %v468_v33, %v465_v32 }
 0x1c7   : > { %1104 = vmatprep.subr.bf16.mxu1 %v1103_v34 }
 0x1c8   : > { %1106 = vmatpush3.bf16.msra.mxu1 %v1103_v34  ;;  %v471_v35 = vpop.xlane.xlu1 %470 }
 0x1cc   : > { %v474_v36 = vpop.xlane.xlu1 %473 }
 0x1cd   : > { %v1107_v37 = vpack.c.bf16 %v474_v36, %v471_v35 }
 0x1cf   : > { %1108 = vmatprep.subr.bf16.mxu1 %v1107_v37 }
 0x1d0   : > { %1110 = vmatpush3.bf16.msra.mxu1 %v1107_v37 }
 0x1d3   : > { %1084 = vmatmul.mubr.msk.f32.vlgmr.msra.gmra.mrb[0].mxu1 %vm475_vm0, %v1583_v38 }
 0x1d4   : > { %1086 = vmatprep.mubr.msk.f32.mxu1 %vm475_vm0, %v1588_v39 }
 0x1d7   : > { %1087 = vmatmul.mubr.msk.f32.gmra.mrb[2].mxu1 %vm475_vm0, %v1597_v40 }
 0x1d8   : > { %1097 = vmatprep.mubr.msk.f32.mxu1 %vm475_vm0, %v459_v31 }
 0x2a6   : > { %v1085_v41 = vpop.f32.mrb[0].mxu1 }
 0x2a7   : > { %580 = vperm.xlu1 %1189, %v1085_v41   ;;  %v554_v42 = vpop.f32.mrb[1].mxu1 }
 0x2a8   : > { %575 = vperm.xlu0 %1188, %v554_v42  }
 0x2aa   : > { %v1088_v44 = vpop.f32.mrb[2].mxu1 }
 0x2ab   : > { %603 = vperm.xlu1 %1189, %v1607_v43   ;;  %v564_v45 = vpop.f32.mrb[3].mxu1 }
 0x2af   : > { %608 = vperm.xlu1 %1189, %v1610_v46  }
 0x2b3   : > { %613 = vperm.xlu1 %1189, %v1613_v47  }
 0x2b7   : > { %590 = vperm.xlu1 %1189, %v1088_v44  }
 0x2bb   : > { %585 = vperm.xlu1 %1189, %v564_v45  }
 0x2bf   : > { %618 = vperm.xlu1 %1189, %v1616_v48  }
 0x2c3   : > { %1190 = vset.pattern.permute.xlu1 %v1381_v28 }
 0x326   : > { %v581_v49 = vpop.permute.xlu1 %580 }
 0x327   : > { %v576_v50 = vpop.permute.xlu0 %575  ;;  %v595_v56 = vsub.f32 %v1558_v21, %v581_v49  ;;  %v596_v57 = vsub.f32 %v1560_v23, %v581_v49 }
 0x328   : > { %v593_v51 = vsub.f32 %v436_v19, %v576_v50  ;;  %v594_v52 = vsub.f32 %v438_v20, %v576_v50 }
 0x32a   : > { %v604_v53 = vpop.permute.xlu1 %603 }
 0x32b   : > { %v1619_v54 = vadd.f32 %v604_v53, %v593_v51  ;;  %v1621_v55 = vadd.f32 %v604_v53, %v594_v52 }
 0x32d   : > { %v629_v58 = vmul.f32 %v1619_v54, %v1619_v54  ;;  %v630_v59 = vmul.f32 %v1621_v55, %v1621_v55 }
 0x32e   : > { %v609_v60 = vpop.permute.xlu1 %608 }
 0x32f   : > { %v1629_v61 = vadd.f32 %v609_v60, %v595_v56  ;;  %v1631_v62 = vadd.f32 %v609_v60, %v596_v57  ;;  %v637_v63 = vadd.f32 %v630_v59, %v629_v58 }
 0x331   : > { %638 = vadd.xlane.f32.xlu1 %v637_v63  ;;  %v631_v1 = vmul.f32 %v1629_v61, %v1629_v61  ;;  %v632_v2 = vmul.f32 %v1631_v62, %v1631_v62 }
 0x332   : > { %v614_v3 = vpop.permute.xlu1 %613 }
 0x333   : > { %v640_v4 = vadd.f32 %v632_v2, %v631_v1 }
 0x335   : > { %641 = vadd.xlane.f32.xlu0 %v640_v4 }
 0x336   : > { %v591_v5 = vpop.permute.xlu1 %590 }
 0x337   : > { %v599_v9 = vsub.f32 %v1568_v27, %v591_v5  ;;  %v600_v10 = vsub.f32 %v1572_v29, %v591_v5 }
 0x33a   : > { %v586_v6 = vpop.permute.xlu1 %585 }
 0x33b   : > { %v597_v7 = vsub.f32 %v1564_v25, %v586_v6  ;;  %v598_v8 = vsub.f32 %v1566_v26, %v586_v6 }
 0x33d   : > { %v1641_v11 = vadd.f32 %v614_v3, %v597_v7  ;;  %v1643_v12 = vadd.f32 %v614_v3, %v598_v8 }
 0x33e   : > { %v619_v13 = vpop.permute.xlu1 %618 }
 0x33f   : > { %v1645_v14 = vadd.f32 %v619_v13, %v599_v9  ;;  %v1647_v15 = vadd.f32 %v619_v13, %v600_v10  ;;  %v633_v16 = vmul.f32 %v1641_v11, %v1641_v11  ;;  %v634_v17 = vmul.f32 %v1643_v12, %v1643_v12 }
 0x341   : > { %v643_v18 = vadd.f32 %v634_v17, %v633_v16  ;;  %v635_v19 = vmul.f32 %v1645_v14, %v1645_v14  ;;  %v636_v20 = vmul.f32 %v1647_v15, %v1647_v15 }
 0x343   : > { %644 = vadd.xlane.f32.xlu0 %v643_v18  ;;  %v646_v21 = vadd.f32 %v636_v20, %v635_v19 }
 0x345   : > { %647 = vadd.xlane.f32.xlu1 %v646_v21 }
 0x356   : > { %740 = vrot.lane.b32.xlu1 %v1610_v46, %s1380_s12 }
 0x359   : > { %738 = vrot.lane.b32.xlu0 %v1607_v43, %s1380_s12 }
 0x35a   : > { %742 = vrot.lane.b32.xlu1 %v1613_v47, %s1380_s12 }
 0x35d   : > { %744 = vrot.lane.b32.xlu0 %v1616_v48, %s1380_s12 }
 0x35e   : > { %783 = vperm.xlu1 %1190, %v1607_v43  }
 0x362   : > { %1191 = vset.pattern.permute.xlu1 %v1379_v0 }
 0x3be   : > { %v639_v22 = vpop.xlane.xlu1 %638 }
 0x3c2   : > { %v642_v23 = vpop.xlane.xlu0 %641 }
 0x3c3   : > { %v1111_v24 = vpack.c.bf16 %v642_v23, %v639_v22 }
 0x3c5   : > { %1112 = vmatprep.subr.bf16.mxu1 %v1111_v24 }
 0x3c6   : > { %1114 = vmatpush3.bf16.msra.mxu1 %v1111_v24 }
 0x3d0   : > { %v645_v25 = vpop.xlane.xlu0 %644 }
 0x3d2   : > { %v648_v26 = vpop.xlane.xlu1 %647 }
 0x3d3   : > { %v1115_v27 = vpack.c.bf16 %v648_v26, %v645_v25 }
 0x3d4   : > { %v739_v37 = vpop.permute.xlu0 %738 }
 0x3d5   : > { %1116 = vmatprep.subr.bf16.mxu1 %v1115_v27 }
 0x3d6   : > { %1118 = vmatpush3.bf16.msra.mxu1 %v1115_v27 }
 0x3d8   : > { %v745_v43 = vpop.permute.xlu0 %744 }
 0x3d9   : > { %1098 = vmatmul.mubr.msk.f32.vlgmr.msra.gmra.mrb[4].mxu1 %vm475_vm0, %v1583_v38  ;;  %v741_v38 = vpop.permute.xlu1 %740 }
 0x3da   : > { %1100 = vmatprep.mubr.msk.f32.mxu1 %vm475_vm0, %v1588_v39 }
 0x3dd   : > { %1101 = vmatmul.mubr.msk.f32.gmra.mrb[6].mxu1 %vm475_vm0, %v1597_v40  ;;  %v743_v50 = vpop.permute.xlu1 %742 }
 0x3e1   : > { %v784_v52 = vpop.permute.xlu1 %783 }
 0x4ac   : > { %v1099_v29 = vpop.f32.mrb[4].mxu1 }
 0x4ad   : > { %v721_v30 = vadd.f32 1e-05, %v1099_v29  ;;  %v715_v31 = vpop.f32.mrb[5].mxu1 }
 0x4ae   : > { %v716_v32 = vadd.f32 1e-05, %v715_v31 }
 0x4af   : > { %1222 = vrsqrt.f32 %v721_v30 }
 0x4b0   : > { %1224 = vrsqrt.f32 %v716_v32  ;;  %v1102_v33 = vpop.f32.mrb[6].mxu1 }
 0x4b1   : > { %v731_v34 = vadd.f32 1e-05, %v1102_v33  ;;  %v725_v35 = vpop.f32.mrb[7].mxu1 }
 0x4b2   : > { %v726_v36 = vadd.f32 1e-05, %v725_v35 }
 0x4b3   : > { %1226 = vrsqrt.f32 %v731_v34 }
 0x4b4   : > { %1228 = vrsqrt.f32 %v726_v36 }
 0x4b9   : > { %v1223_v39 = vpop.eup %1222 }
 0x4ba   : > { %v1225_v40 = vpop.eup %1224  ;;  %v751_v41 = vmul.f32 %v1223_v39, %v741_v38 }
 0x4bb   : > { %v750_v42 = vmul.f32 %v1225_v40, %v739_v37 }
 0x4bc   : > { %761 = vperm.xlu0 %1188, %v751_v41  }
 0x4bd   : > { %v1227_v44 = vpop.eup %1226  ;;  %756 = vperm.xlu1 %1191, %v750_v42  }
 0x4be   : > { %v753_v45 = vmul.f32 %v1227_v44, %v745_v43  ;;  %v1229_v49 = vpop.eup %1228 }
 0x4bf   : > { %v752_v51 = vmul.f32 %v1229_v49, %v743_v50 }
 0x4c0   : > { %771 = vperm.xlu0 %1188, %v753_v45  }
 0x4c1   : > { %1193 = vset.pattern.permute.xlu1 %v1381_v28 }
 0x4c2   : > { %791 = vperm.xlu1 %1193, %v1613_v47  }
 0x4c4   : > { %1192 = vset.pattern.permute.xlu0 %v1381_v28 }
 0x4c5   : > { %787 = vperm.xlu0 %1192, %v1610_v46  }
 0x4c6   : > { %1194 = vset.pattern.permute.xlu1 %v1379_v0 }
 0x4c7   : > { %766 = vperm.xlu1 %1194, %v752_v51  }
 0x4cb   : > { %1195 = vset.pattern.permute.xlu1 %v1381_v28 }
 0x4cc   : > { %795 = vperm.xlu1 %1195, %v1616_v48  }
 0x53b   : > { %v762_v53 = vpop.permute.xlu0 %761 }
 0x53c   : > { %v757_v56 = vpop.permute.xlu1 %756  ;;  %v776_v46 = vmul.f32 %v762_v53, %v1629_v61  ;;  %v777_v0 = vmul.f32 %v762_v53, %v1631_v62 }
 0x53d   : > { %v774_v57 = vmul.f32 %v757_v56, %v1619_v54  ;;  %v775_v58 = vmul.f32 %v757_v56, %v1621_v55 }
 0x53f   : > { %v798_v59 = vadd.f32 %v784_v52, %v774_v57  ;;  %v799_v60 = vadd.f32 %v784_v52, %v775_v58  ;;  %v772_v47 = vpop.permute.xlu0 %771 }
 0x540   : > { %v780_v10 = vmul.f32 %v772_v47, %v1645_v14  ;;  %v781_v61 = vmul.f32 %v772_v47, %v1647_v15 }
 0x541   : > { %v1043_v63 = vmul.f32 -1.442695, %v798_v59  ;;  %v1044_v1 = vmul.f32 -1.442695, %v799_v60  ;;  %v792_v2 = vpop.permute.xlu1 %791 }
 0x543   : > { %1230 = vpow2.f32 %v1043_v63 }
 0x544   : > { %1232 = vpow2.f32 %v1044_v1  ;;  %v788_v48 = vpop.permute.xlu0 %787 }
 0x545   : > { %v800_v3 = vadd.f32 %v788_v48, %v776_v46  ;;  %v801_v4 = vadd.f32 %v788_v48, %v777_v0 }
 0x546   : > { %v767_v5 = vpop.permute.xlu1 %766 }
 0x547   : > { %v1045_v6 = vmul.f32 -1.442695, %v800_v3  ;;  %v1046_v54 = vmul.f32 -1.442695, %v801_v4  ;;  %v778_v55 = vmul.f32 %v767_v5, %v1641_v11  ;;  %v779_v7 = vmul.f32 %v767_v5, %v1643_v12 }
 0x549   : > { %1234 = vpow2.f32 %v1045_v6  ;;  %v802_v8 = vadd.f32 %v792_v2, %v778_v55  ;;  %v803_v9 = vadd.f32 %v792_v2, %v779_v7 }
 0x54a   : > { %1236 = vpow2.f32 %v1046_v54 }
 0x54b   : > { %v1047_v62 = vmul.f32 -1.442695, %v802_v8  ;;  %v1048_v13 = vmul.f32 -1.442695, %v803_v9  ;;  %v796_v16 = vpop.permute.xlu1 %795 }
 0x54c   : > { %v804_v17 = vadd.f32 %v796_v16, %v780_v10  ;;  %v805_v18 = vadd.f32 %v796_v16, %v781_v61 }
 0x54d   : > { %v1231_v19 = vpop.eup %1230  ;;  %1238 = vpow2.f32 %v1047_v62 }
 0x54e   : > { %v1233_v20 = vpop.eup %1232  ;;  %v830_v11 = vadd.f32 1.0, %v1231_v19  ;;  %1240 = vpow2.f32 %v1048_v13  ;;  %v1049_v12 = vmul.f32 -1.442695, %v804_v17  ;;  %v1050_v22 = vmul.f32 -1.442695, %v805_v18 }
 0x54f   : > { %v831_v21 = vadd.f32 1.0, %v1233_v20 }
 0x550   : > { %1242 = vrcp.f32 %v830_v11 }
 0x551   : > { %1244 = vrcp.f32 %v831_v21 }
 0x552   : > { %1246 = vpow2.f32 %v1049_v12 }
 0x553   : > { %v1235_v14 = vpop.eup %1234  ;;  %1248 = vpow2.f32 %v1050_v22 }
 0x554   : > { %v1237_v15 = vpop.eup %1236  ;;  %v832_v23 = vadd.f32 1.0, %v1235_v14 }
 0x555   : > { %v833_v24 = vadd.f32 1.0, %v1237_v15 }
 0x556   : > { %1250 = vrcp.f32 %v832_v23 }
 0x557   : > { %v1239_v25 = vpop.eup %1238  ;;  %1252 = vrcp.f32 %v833_v24 }
 0x558   : > { %v1241_v26 = vpop.eup %1240  ;;  %v834_v27 = vadd.f32 1.0, %v1239_v25 }
 0x559   : > { %v835_v28 = vadd.f32 1.0, %v1241_v26 }
 0x55a   : > { %v1243_v29 = vpop.eup %1242  ;;  %1254 = vrcp.f32 %v834_v27 }
 0x55b   : > { %v1245_v30 = vpop.eup %1244  ;;  %v854_v31 = vmul.f32 %v1243_v29, %v798_v59  ;;  %1256 = vrcp.f32 %v835_v28 }
 0x55c   : > { %v1247_v32 = vpop.eup %1246  ;;  %v855_v33 = vmul.f32 %v1245_v30, %v799_v60 }
 0x55d   : > { %v1249_v34 = vpop.eup %1248  ;;  %862 = vst [vmem:[%s271_s14] sm:$0xff] %v854_v31  ;;  %v836_v35 = vadd.f32 1.0, %v1247_v32 }
 0x55e   : > { %863 = vst [vmem:[%s271_s14 + $0x8] sm:$0xff] %v855_v33  ;;  %v837_v36 = vadd.f32 1.0, %v1249_v34 }
 0x55f   : > { %1258 = vrcp.f32 %v836_v35 }
 0x560   : > { %v1251_v37 = vpop.eup %1250  ;;  %1260 = vrcp.f32 %v837_v36 }
 0x561   : > { %v1253_v38 = vpop.eup %1252  ;;  %v856_v39 = vmul.f32 %v1251_v37, %v800_v3 }
 0x562   : > { %v857_v40 = vmul.f32 %v1253_v38, %v801_v4 }
 0x563   : > { %864 = vst [vmem:[%s271_s14 + $0x10] sm:$0xff] %v856_v39 }
 0x564   : > { %v1255_v41 = vpop.eup %1254  ;;  %865 = vst [vmem:[%s271_s14 + $0x18] sm:$0xff] %v857_v40 }
 0x565   : > { %v1257_v42 = vpop.eup %1256  ;;  %v858_v43 = vmul.f32 %v1255_v41, %v802_v8 }
 0x566   : > { %v859_v44 = vmul.f32 %v1257_v42, %v803_v9 }
 0x567   : > { %866 = vst [vmem:[%s271_s14 + $0x20] sm:$0xff] %v858_v43 }
 0x568   : > { %867 = vst [vmem:[%s271_s14 + $0x28] sm:$0xff] %v859_v44 }
 0x569   : > { %v1259_v45 = vpop.eup %1258 }
 0x56a   : > { %v1261_v49 = vpop.eup %1260  ;;  %v860_v50 = vmul.f32 %v1259_v45, %v804_v17 }
 0x56b   : > { %v861_v51 = vmul.f32 %v1261_v49, %v805_v18 }
 0x56c   : > { %868 = vst [vmem:[%s271_s14 + $0x30] sm:$0xff] %v860_v50 }
 0x56d   : > { %869 = vst [vmem:[%s271_s14 + $0x38] sm:$0xff] %v861_v51 }
 0x56e   : > { %1305 = shalt.err (!%p1302_p4)
}
 0x56f   : > { %s1306_s26 = scalar_lea.hbm %s1686_s9, 1024  ;;  %s1310_s12 = scalar_lea.hbm %s1741_s4, 2048 }
 0x570   : > { %p1307_p7 = scmp.ne.s32.totalorder %s1686_s9, %s1306_s26  ;;  %p1311_p1 = scmp.lt.u32.totalorder %s1686_s9, %s1741_s4 }
 0x571   : > { %p1312_p3 = scmp.lt.u32.totalorder %s1310_s12, %s1306_s26  ;;  %p1314_p9 = scmp.lt.u32.totalorder %s1306_s26, %s1686_s9 }
 0x572   : > { %p1308_p10 = pnand %p1307_p7, %p1749_p11 }
 0x573   : > { %p1313_p8 = por %p1312_p3, %p1311_p1 }
 0x574   : > { %p1309_p12 = pneg %p1308_p10 }
 0x575   : > { %p1315_p0 = por %p1314_p9, %p1313_p8 }
 0x577   : > { %p1316_p6 = pnand %p1315_p0, %p1309_p12 }
 0x579   : > { %1319 = shalt.err (!%p1316_p6)
}
 0x57a   : > { %s1383_s6 = smov 256   ;;  %s1384_s7 = smov 16  }
 0x57b   : > { %1121 = dma.vmem_to_hbm [thread:$0]  (%p1749_p11), %s1688_s5, 1024, %s1686_s9, %s871_s11, %s1383_s6, %s1383_s6, %s1384_s7  }
 0x57c PF: > { %s902_s8 = sand.u32 1, %s1354_s15   ;;  %p1750_p13 = scmp.ne.s32.totalorder %s1746_s30, 0 }
 0x57d   : > { %p1751_p2 = scmp.ge.s32.totalorder %s1374_s20, 2  ;;  %s903_s18 = scalar_lea.sflag [#allocation4], %s902_s8 }
 0x57f   : > { %p1128_p5 = pnand %p1751_p2, %p1750_p13 }
 0x581   : > { %1349 = dma.done.wait (!%p1128_p5), %s903_s18, 1024  }
 0x582   : > { %1351 = vsyncadd (!%p1128_p5), %s903_s18, 4294966272  ;;  %s20_s20 = sadd.s32 1, %s1374_s20   ;;  %s1752_s15 = smov %s1358_s16 }
 0x583   : > { %p17_p4 = scmp.ge.s32.totalorder %s20_s20, 4   ;;  %s1753_s16 = smov %s1362_s17 }
 0x584   : > { %s1754_s17 = smov %s1466_s29  ;;  %s1755_s18 = smov %s1370_s19 }
 0x585   : > { %s1756_s19 = smov %s1758_s23  ;;  %19 = sbr.rel (!%p17_p4) target bundleno = 6 (0x6), region = 87 }
 0x58c   :  { %908 = vsyncpa [#allocation3], 1 }
 0x58d   :  { %910 = vsyncpa [#allocation3 + $0x1], 1 }
 0x58e   :  { %911 = vsyncpa [#allocation4], 1 }
 0x58f   :  { %913 = vsyncpa [#allocation4 + $0x1], 1 }

</bundles_post_ra>
